<compile_context>
chip_gen: v7x
topology: tpu7x:2x2x1
jax: 0.10.0
libtpu: 0.0.40
codegen_flags: <defaults>
</compile_context>

<pallas_src>
import jax
import jax.numpy as jnp
from jax.experimental import pallas as pl
from jax.experimental.pallas import tpu as pltpu

NEG_SLOPE = 0.01   # torch F.leaky_relu default
F_PAD = 128        # padded lane width for node-feature / out-channel dims
EA_PAD = 8         # padded width for edge features (dim=3 -> 8)


def _round_up(v, m):
    return ((v + m - 1) // m) * m


def _pad2(a, rows, cols):
    out = jnp.zeros((rows, cols), jnp.float32)
    return out.at[: a.shape[0], : a.shape[1]].set(a.astype(jnp.float32))


def _vmem_limit_bytes():
    """Per-generation VMEM budget: ~75% of physical, capped at 112 MiB."""
    try:
        cap = int(pltpu.get_tpu_info().vmem_capacity_bytes)
    except Exception:
        cap = 64 * 1024 * 1024
    return max(32 * 1024 * 1024, min(cap * 3 // 4, 112 * 1024 * 1024))


def _decoder_kernel(
    x_ref, src_ref, dst_ref, ea_ref,
    wcat_ref, we_ref, b_ref, bu_ref,
    out_ref,
    h_ref, p_ref, agg_ref,
):
    layer = pl.program_id(0)
    tile = pl.program_id(1)
    n_layers = pl.num_programs(0)
    n_tiles = pl.num_programs(1)
    n_pad = h_ref.shape[0]

    # ---- per-layer prologue: one fused projection h @ [W_i | W_j | W_up],
    #      bf16 p scratch, agg seeded with the "upsample" residual ----
    @pl.when(tile == 0)
    def _():
        @pl.when(layer == 0)
        def _():
            h_ref[...] = x_ref[...]

        h = h_ref[...]
        proj = jnp.dot(h, wcat_ref[...], preferred_element_type=jnp.float32)
        p_ref[...] = proj[:, : 2 * F_PAD].astype(jnp.bfloat16)   # [p_i | p_j]
        agg_ref[...] = proj[:, 2 * F_PAD:] + bu_ref[...]          # h @ W_up + b_up

    # ---- per-edge-tile message + scatter-add --------------------------------
    src = src_ref[...]                     # (edge_tile, 1) int32
    dst = dst_ref[...]                     # (edge_tile, 1) int32
    e_tile = src.shape[0]
    lane = jax.lax.broadcasted_iota(jnp.int32, (e_tile, n_pad), 1)
    # One-hot rows built in-kernel; padded edges use an out-of-range sentinel
    # index -> all-zero rows -> contribute nothing.
    oh_src = src == lane                   # (edge_tile, n_pad) bool
    oh_dst = dst == lane

    p = p_ref[...]
    p_i = p[:, :F_PAD]
    p_j = p[:, F_PAD:]

    z = (
        jnp.dot(oh_dst.astype(jnp.bfloat16), p_i,
                preferred_element_type=jnp.float32)               # x_i @ W_i gathered
        + jnp.dot(oh_src.astype(jnp.bfloat16), p_j,
                  preferred_element_type=jnp.float32)             # x_j @ W_j gathered
        + jnp.dot(ea_ref[...], we_ref[...],
                  preferred_element_type=jnp.float32)             # edge_attr @ W_e
        + b_ref[...]
    )
    msg = jnp.where(z > 0, z, NEG_SLOPE * z)                      # leaky_relu
    # scatter-add into destination nodes: contract the edge axis (f32 msg).
    agg_ref[...] += jax.lax.dot_general(
        oh_dst.astype(jnp.float32), msg, (((0,), (0,)), ((), ())),
        preferred_element_type=jnp.float32)

    # ---- per-layer epilogue: hand off to next layer / write output ----------
    @pl.when(tile == n_tiles - 1)
    def _():
        h_ref[...] = agg_ref[...]

        @pl.when(layer == n_layers - 1)
        def _():
            out_ref[...] = jnp.tanh(agg_ref[...])


def _linear_params(key, fan_in, fan_out):
    """Deterministic init ~ torch.nn.Linear default (uniform +-1/sqrt(fan_in))."""
    kw, kb = jax.random.split(key)
    bound = 1.0 / jnp.sqrt(jnp.float32(fan_in))
    w = jax.random.uniform(kw, (fan_in, fan_out), jnp.float32, -bound, bound)
    b = jax.random.uniform(kb, (1, fan_out), jnp.float32, -bound, bound)
    return w, b


def init_decoder_params(channels, dim, key):
    """Params for conv1 (66->32), conv2 (32->16), conv3 (16->channels)."""
    params = []
    dims = [(64 + 2, 32), (32, 16), (16, channels)]
    keys = jax.random.split(key, 6)
    for li, (cin, cout) in enumerate(dims):
        w_lin, b_lin = _linear_params(keys[2 * li], 2 * cin + dim, cout)
        w_up, b_up = _linear_params(keys[2 * li + 1], cin, cout)
        # split lin weight into [x_i | x_j | edge_attr] blocks
        wi = w_lin[:cin]
        wj = w_lin[cin:2 * cin]
        we = w_lin[2 * cin:]
        params.append((wi, wj, we, b_lin, w_up, b_up))
    return params


def decoder_forward(x, edge_index, edge_attr, lower, upper, params, channels,
                    *, edge_tile=512):
    """x: [N, 64], lower/upper: [N, 1], edge_index: [2, E] int32, edge_attr: [E, dim]."""
    n = x.shape[0]
    e = edge_index.shape[1]
    dim = edge_attr.shape[1]
    num_layers = len(params)

    n_pad = _round_up(max(n, 1), 8)

    # edge tile: multiple of 128, no larger than the (rounded) edge count, and
    # capped so the in-kernel (edge_tile, n_pad) one-hot temporaries stay ~4 MiB.
    e_rounded = _round_up(max(e, 1), 128)
    vmem_cap_rows = max(128, ((4 * 1024 * 1024) // (4 * n_pad)) // 128 * 128)
    edge_tile = max(128, min(_round_up(edge_tile, 128), e_rounded, vmem_cap_rows))
    e_pad = _round_up(max(e, 1), edge_tile)
    num_e_tiles = e_pad // edge_tile

    # --- node features, padded to a 128-wide slab ---
    x66 = jnp.concatenate([x, lower, upper], axis=1).astype(jnp.float32)
    x_pad = jnp.zeros((n_pad, F_PAD), jnp.float32).at[:n, : x66.shape[1]].set(x66)

    # --- edge indices (padded edges -> sentinel n_pad => zero one-hot rows) ---
    src_ids = jnp.full((e_pad, 1), n_pad, jnp.int32).at[:e, 0].set(
        edge_index[0].astype(jnp.int32))
    dst_ids = jnp.full((e_pad, 1), n_pad, jnp.int32).at[:e, 0].set(
        edge_index[1].astype(jnp.int32))

    # --- narrow edge-feature slab ---
    ea = jnp.zeros((e_pad, EA_PAD), jnp.float32).at[:e, :dim].set(
        edge_attr.astype(jnp.float32))

    # --- per-layer weights: Wcat = [W_i | W_j | W_up] padded to [128, 384] ---
    wcat_list = []
    for (wi, wj, we, b, wu, bu) in params:
        cin, cout = wi.shape
        w = jnp.zeros((F_PAD, 3 * F_PAD), jnp.float32)
        w = w.at[:cin, :cout].set(wi.astype(jnp.float32))
        w = w.at[:cin, F_PAD:F_PAD + cout].set(wj.astype(jnp.float32))
        w = w.at[:cin, 2 * F_PAD:2 * F_PAD + cout].set(wu.astype(jnp.float32))
        wcat_list.append(w)
    Wcat = jnp.stack(wcat_list)                                    # [L, 128, 384]
    We = jnp.stack([_pad2(p[2], EA_PAD, F_PAD) for p in params])   # [L, 8, 128]
    B = jnp.stack([_pad2(p[3], 1, F_PAD) for p in params])         # [L, 1, 128]
    Bu = jnp.stack([_pad2(p[5], 1, F_PAD) for p in params])        # [L, 1, 128]

    # --- advisory cost estimate ---
    flops = int(
        num_layers * 2 * n_pad * F_PAD * 3 * F_PAD                       # prologue
        + num_layers * e_pad * (2 * 2 * n_pad * F_PAD                    # gathers
                                + 2 * EA_PAD * F_PAD                     # edge proj
                                + 2 * n_pad * F_PAD)                     # scatter
    )
    bytes_accessed = int(
        x_pad.size * 4
        + num_layers * ((src_ids.size + dst_ids.size) * 4 + ea.size * 4)
        + (Wcat.size + We.size + B.size + Bu.size) * 4
        + n_pad * F_PAD * 4
    )
    cost = pl.CostEstimate(flops=flops, transcendentals=int(n_pad * F_PAD),
                           bytes_accessed=bytes_accessed)

    out = pl.pallas_call(
        _decoder_kernel,
        out_shape=jax.ShapeDtypeStruct((n_pad, F_PAD), jnp.float32),
        grid_spec=pltpu.PrefetchScalarGridSpec(
            num_scalar_prefetch=0,
            grid=(num_layers, num_e_tiles),
            in_specs=[
                pl.BlockSpec((n_pad, F_PAD), lambda l, t: (0, 0)),            # x (resident)
                pl.BlockSpec((edge_tile, 1), lambda l, t: (t, 0)),            # src ids tile
                pl.BlockSpec((edge_tile, 1), lambda l, t: (t, 0)),            # dst ids tile
                pl.BlockSpec((edge_tile, EA_PAD), lambda l, t: (t, 0)),       # edge_attr tile
                pl.BlockSpec((None, F_PAD, 3 * F_PAD), lambda l, t: (l, 0, 0)),  # [Wi|Wj|Wup]
                pl.BlockSpec((None, EA_PAD, F_PAD), lambda l, t: (l, 0, 0)),     # W_e
                pl.BlockSpec((None, 1, F_PAD), lambda l, t: (l, 0, 0)),          # b (lin)
                pl.BlockSpec((None, 1, F_PAD), lambda l, t: (l, 0, 0)),          # b_up
            ],
            out_specs=pl.BlockSpec((n_pad, F_PAD), lambda l, t: (0, 0)),
            scratch_shapes=[
                pltpu.VMEM((n_pad, F_PAD), jnp.float32),       # h   (node features)
                pltpu.VMEM((n_pad, 2 * F_PAD), jnp.bfloat16),  # p = [p_i | p_j]
                pltpu.VMEM((n_pad, F_PAD), jnp.float32),       # agg accumulator
            ],
        ),
        compiler_params=pltpu.CompilerParams(
            dimension_semantics=("arbitrary", "arbitrary"),
            vmem_limit_bytes=_vmem_limit_bytes(),
        ),
        cost_estimate=cost,
    )(x_pad, src_ids, dst_ids, ea, Wcat, We, B, Bu)

    return out[:n, :channels]


def decoder_reference(x, edge_index, edge_attr, lower, upper, params):
    """Pure-JAX reference matching the PyTorch semantics."""
    h = jnp.concatenate([x, lower, upper], axis=1).astype(jnp.float32)
    src, dst = edge_index[0], edge_index[1]
    n = x.shape[0]
    for (wi, wj, we, b, wu, bu) in params:
        xi = h[dst]
        xj = h[src]
        z = xi @ wi + xj @ wj + edge_attr @ we + b
        msg = jnp.where(z > 0, z, NEG_SLOPE * z)
        agg = jnp.zeros((n, msg.shape[1]), jnp.float32).at[dst].add(msg)
        h = agg + h @ wu + bu
    return jnp.tanh(h)


if __name__ == "__main__":
    key = jax.random.PRNGKey(0)
    k_x, k_lo, k_hi, k_ei, k_ea, k_p = jax.random.split(key, 6)

    N = 8          # num_nodes
    E = 16         # num_edges
    DIM = 3        # edge feature dim
    CHANNELS = 4   # decoder output channels

    x = jax.random.normal(k_x, (N, 64), jnp.float32)
    lower = jax.random.normal(k_lo, (N, 1), jnp.float32)
    upper = jax.random.normal(k_hi, (N, 1), jnp.float32)
    edge_index = jax.random.randint(k_ei, (2, E), 0, N, dtype=jnp.int32)
    edge_attr = jax.random.normal(k_ea, (E, DIM), jnp.float32)

    params = init_decoder_params(CHANNELS, DIM, k_p)

    out = decoder_forward(x, edge_index, edge_attr, lower, upper, params, CHANNELS)
    out = jax.block_until_ready(out)

    ref = decoder_reference(x, edge_index, edge_attr, lower, upper, params)
    assert out.shape == (N, CHANNELS), out.shape
    err = jnp.max(jnp.abs(out - ref))
    # bf16 storage of the per-layer projections adds ~4e-3 relative error to the
    # message path (one-hots are exact); measured error is ~1e-3 at this scale.
    assert jnp.allclose(out, ref, atol=2e-2, rtol=2e-2), f"max abs err {err}"
    print("KERNEL_OK")
</pallas_src>

<mosaic_0001>
module attributes {stable_mosaic.version = 11 : i64} {
  func.func @_decoder_kernel(%arg0: i32, %arg1: i32, %arg2: memref<8x128xf32, #tpu.memory_space<vmem>>, %arg3: memref<128x1xi32, #tpu.memory_space<vmem>>, %arg4: memref<128x1xi32, #tpu.memory_space<vmem>>, %arg5: memref<128x8xf32, #tpu.memory_space<vmem>>, %arg6: memref<1x128x384xf32, #tpu.memory_space<vmem>>, %arg7: memref<1x8x128xf32, #tpu.memory_space<vmem>>, %arg8: memref<1x1x128xf32, #tpu.memory_space<vmem>>, %arg9: memref<1x1x128xf32, #tpu.memory_space<vmem>>, %arg10: memref<8x128xf32, #tpu.memory_space<vmem>>, %arg11: memref<8x128xf32, #tpu.memory_space<vmem>>, %arg12: memref<8x256xbf16, #tpu.memory_space<vmem>>, %arg13: memref<8x128xf32, #tpu.memory_space<vmem>>) attributes {dimension_semantics = [#tpu.dimension_semantics<arbitrary>, #tpu.dimension_semantics<arbitrary>], iteration_bounds = array<i64: 3, 1>, scalar_prefetch = 0 : i64, scratch_operands = 3 : i64, tpu.core_type = #tpu.core_type<tc>, window_params = [{pipeline_mode = #tpu.pipeline_mode<synchronous>, transform_indices = @transform_0, window_bounds = array<i64: 8, 128>}, {transform_indices = @transform_1, window_bounds = array<i64: 128, 1>}, {transform_indices = @transform_2, window_bounds = array<i64: 128, 1>}, {transform_indices = @transform_3, window_bounds = array<i64: 128, 8>}, {transform_indices = @transform_4, window_bounds = array<i64: 1, 128, 384>}, {transform_indices = @transform_5, window_bounds = array<i64: 1, 8, 128>}, {transform_indices = @transform_6, window_bounds = array<i64: 1, 1, 128>}, {transform_indices = @transform_7, window_bounds = array<i64: 1, 1, 128>}, {pipeline_mode = #tpu.pipeline_mode<synchronous>, transform_indices = @transform_8, window_bounds = array<i64: 8, 128>}]} {
    %c0_i32 = arith.constant 0 : i32
    %0 = arith.cmpi eq, %arg1, %c0_i32 : i32
    %1 = arith.extui %0 : i1 to i32
    %c0_i32_0 = arith.constant 0 : i32
    %2 = arith.cmpi ne, %1, %c0_i32_0 : i32
    scf.if %2 {
      %c0_i32_25 = arith.constant 0 : i32
      %45 = arith.cmpi eq, %arg0, %c0_i32_25 : i32
      %46 = arith.extui %45 : i1 to i32
      %c0_i32_26 = arith.constant 0 : i32
      %47 = arith.cmpi ne, %46, %c0_i32_26 : i32
      scf.if %47 {
        %c0_40 = arith.constant 0 : index
        %c0_41 = arith.constant 0 : index
        %61 = vector.load %arg2[%c0_40, %c0_41] : memref<8x128xf32, #tpu.memory_space<vmem>>, vector<8x128xf32>
        %c0_42 = arith.constant 0 : index
        %c0_43 = arith.constant 0 : index
        %62 = vector.load %arg11[%c0_42, %c0_43] : memref<8x128xf32, #tpu.memory_space<vmem>>, vector<8x128xf32>
        tpu.vector_store %arg11[%c0_42, %c0_43], %61 {strides = array<i32>} : memref<8x128xf32, #tpu.memory_space<vmem>>, vector<8x128xf32>,
      } else {
      }
      %c0_27 = arith.constant 0 : index
      %c0_28 = arith.constant 0 : index
      %48 = vector.load %arg11[%c0_27, %c0_28] : memref<8x128xf32, #tpu.memory_space<vmem>>, vector<8x128xf32>
      %c0_29 = arith.constant 0 : index
      %c0_30 = arith.constant 0 : index
      %c0_31 = arith.constant 0 : index
      %49 = vector.load %arg6[%c0_29, %c0_30, %c0_31] : memref<1x128x384xf32, #tpu.memory_space<vmem>>, vector<1x128x384xf32>
      %50 = vector.shape_cast %49 : vector<1x128x384xf32> to vector<128x384xf32>
      %cst_32 = arith.constant dense<0.000000e+00> : vector<8x384xf32>
      %51 = tpu.matmul %48, %50, %cst_32 {dimension_numbers = #tpu.dot_dimension_numbers<[1], [0], [0], [1], [0, 0, 1, 1], [], []>} : vector<8x128xf32>, vector<128x384xf32>, vector<8x384xf32> -> vector<8x384xf32>
      %52 = vector.extract_strided_slice %51 {offsets = [0, 0], sizes = [8, 256], strides = [1, 1]} : vector<8x384xf32> to vector<8x256xf32>
      %53 = arith.truncf %52 : vector<8x256xf32> to vector<8x256xbf16>
      %c0_33 = arith.constant 0 : index
      %c0_34 = arith.constant 0 : index
      %54 = vector.load %arg12[%c0_33, %c0_34] : memref<8x256xbf16, #tpu.memory_space<vmem>>, vector<8x256xbf16>
      tpu.vector_store %arg12[%c0_33, %c0_34], %53 {strides = array<i32>} : memref<8x256xbf16, #tpu.memory_space<vmem>>, vector<8x256xbf16>,
      %55 = vector.extract_strided_slice %51 {offsets = [0, 256], sizes = [8, 128], strides = [1, 1]} : vector<8x384xf32> to vector<8x128xf32>
      %c0_35 = arith.constant 0 : index
      %c0_36 = arith.constant 0 : index
      %c0_37 = arith.constant 0 : index
      %56 = vector.load %arg9[%c0_35, %c0_36, %c0_37] : memref<1x1x128xf32, #tpu.memory_space<vmem>>, vector<1x1x128xf32>
      %57 = vector.shape_cast %56 : vector<1x1x128xf32> to vector<1x128xf32>
      %58 = vector.broadcast %57 : vector<1x128xf32> to vector<8x128xf32>
      %59 = arith.addf %55, %58 : vector<8x128xf32>
      %c0_38 = arith.constant 0 : index
      %c0_39 = arith.constant 0 : index
      %60 = vector.load %arg13[%c0_38, %c0_39] : memref<8x128xf32, #tpu.memory_space<vmem>>, vector<8x128xf32>
      tpu.vector_store %arg13[%c0_38, %c0_39], %59 {strides = array<i32>} : memref<8x128xf32, #tpu.memory_space<vmem>>, vector<8x128xf32>,
    } else {
    }
    %c0 = arith.constant 0 : index
    %c0_1 = arith.constant 0 : index
    %3 = vector.load %arg3[%c0, %c0_1] : memref<128x1xi32, #tpu.memory_space<vmem>>, vector<128x1xi32>
    %c0_2 = arith.constant 0 : index
    %c0_3 = arith.constant 0 : index
    %4 = vector.load %arg4[%c0_2, %c0_3] : memref<128x1xi32, #tpu.memory_space<vmem>>, vector<128x1xi32>
    %5 = tpu.iota {dimensions = array<i32: 1>} : vector<128x8xi32>
    %6 = vector.broadcast %3 : vector<128x1xi32> to vector<128x8xi32>
    %7 = arith.cmpi eq, %6, %5 : vector<128x8xi32>
    %8 = vector.broadcast %4 : vector<128x1xi32> to vector<128x8xi32>
    %9 = arith.cmpi eq, %8, %5 : vector<128x8xi32>
    %c0_4 = arith.constant 0 : index
    %c0_5 = arith.constant 0 : index
    %10 = vector.load %arg12[%c0_4, %c0_5] : memref<8x256xbf16, #tpu.memory_space<vmem>>, vector<8x256xbf16>
    %11 = vector.extract_strided_slice %10 {offsets = [0, 0], sizes = [8, 128], strides = [1, 1]} : vector<8x256xbf16> to vector<8x128xbf16>
    %12 = vector.extract_strided_slice %10 {offsets = [0, 128], sizes = [8, 128], strides = [1, 1]} : vector<8x256xbf16> to vector<8x128xbf16>
    %13 = arith.extui %9 : vector<128x8xi1> to vector<128x8xi32>
    %14 = arith.sitofp %13 : vector<128x8xi32> to vector<128x8xf32>
    %15 = arith.truncf %14 : vector<128x8xf32> to vector<128x8xbf16>
    %cst = arith.constant dense<0.000000e+00> : vector<128x128xf32>
    %16 = tpu.matmul %15, %11, %cst {dimension_numbers = #tpu.dot_dimension_numbers<[1], [0], [0], [1], [0, 0, 1, 1], [], []>} : vector<128x8xbf16>, vector<8x128xbf16>, vector<128x128xf32> -> vector<128x128xf32>
    %17 = arith.extui %7 : vector<128x8xi1> to vector<128x8xi32>
    %18 = arith.sitofp %17 : vector<128x8xi32> to vector<128x8xf32>
    %19 = arith.truncf %18 : vector<128x8xf32> to vector<128x8xbf16>
    %cst_6 = arith.constant dense<0.000000e+00> : vector<128x128xf32>
    %20 = tpu.matmul %19, %12, %cst_6 {dimension_numbers = #tpu.dot_dimension_numbers<[1], [0], [0], [1], [0, 0, 1, 1], [], []>} : vector<128x8xbf16>, vector<8x128xbf16>, vector<128x128xf32> -> vector<128x128xf32>
    %21 = arith.addf %16, %20 : vector<128x128xf32>
    %c0_7 = arith.constant 0 : index
    %c0_8 = arith.constant 0 : index
    %22 = vector.load %arg5[%c0_7, %c0_8] : memref<128x8xf32, #tpu.memory_space<vmem>>, vector<128x8xf32>
    %c0_9 = arith.constant 0 : index
    %c0_10 = arith.constant 0 : index
    %c0_11 = arith.constant 0 : index
    %23 = vector.load %arg7[%c0_9, %c0_10, %c0_11] : memref<1x8x128xf32, #tpu.memory_space<vmem>>, vector<1x8x128xf32>
    %24 = vector.shape_cast %23 : vector<1x8x128xf32> to vector<8x128xf32>
    %cst_12 = arith.constant dense<0.000000e+00> : vector<128x128xf32>
    %25 = tpu.matmul %22, %24, %cst_12 {dimension_numbers = #tpu.dot_dimension_numbers<[1], [0], [0], [1], [0, 0, 1, 1], [], []>} : vector<128x8xf32>, vector<8x128xf32>, vector<128x128xf32> -> vector<128x128xf32>
    %26 = arith.addf %21, %25 : vector<128x128xf32>
    %c0_13 = arith.constant 0 : index
    %c0_14 = arith.constant 0 : index
    %c0_15 = arith.constant 0 : index
    %27 = vector.load %arg8[%c0_13, %c0_14, %c0_15] : memref<1x1x128xf32, #tpu.memory_space<vmem>>, vector<1x1x128xf32>
    %28 = vector.shape_cast %27 : vector<1x1x128xf32> to vector<1x128xf32>
    %29 = vector.broadcast %28 : vector<1x128xf32> to vector<128x128xf32>
    %30 = arith.addf %26, %29 : vector<128x128xf32>
    %cst_16 = arith.constant 0.000000e+00 : f32
    %31 = vector.broadcast %cst_16 : f32 to vector<128x128xf32>
    %32 = arith.cmpf ogt, %30, %31 : vector<128x128xf32>
    %cst_17 = arith.constant 0.00999999977 : f32
    %33 = vector.broadcast %cst_17 : f32 to vector<128x128xf32>
    %34 = arith.mulf %33, %30 : vector<128x128xf32>
    %35 = arith.select %32, %30, %34 : vector<128x128xi1>, vector<128x128xf32>
    %c0_18 = arith.constant 0 : index
    %c0_19 = arith.constant 0 : index
    %36 = vector.load %arg13[%c0_18, %c0_19] : memref<8x128xf32, #tpu.memory_space<vmem>>, vector<8x128xf32>
    %37 = arith.extui %9 : vector<128x8xi1> to vector<128x8xi32>
    %38 = arith.sitofp %37 : vector<128x8xi32> to vector<128x8xf32>
    %cst_20 = arith.constant dense<0.000000e+00> : vector<8x128xf32>
    %39 = tpu.matmul %38, %35, %cst_20 {dimension_numbers = #tpu.dot_dimension_numbers<[0], [0], [1], [1], [0, 1, 1, 1], [], []>} : vector<128x8xf32>, vector<128x128xf32>, vector<8x128xf32> -> vector<8x128xf32>
    %40 = arith.addf %36, %39 : vector<8x128xf32>
    %c0_21 = arith.constant 0 : index
    %c0_22 = arith.constant 0 : index
    %41 = vector.load %arg13[%c0_21, %c0_22] : memref<8x128xf32, #tpu.memory_space<vmem>>, vector<8x128xf32>
    tpu.vector_store %arg13[%c0_21, %c0_22], %40 {strides = array<i32>} : memref<8x128xf32, #tpu.memory_space<vmem>>, vector<8x128xf32>,
    %c0_i32_23 = arith.constant 0 : i32
    %42 = arith.cmpi eq, %arg1, %c0_i32_23 : i32
    %43 = arith.extui %42 : i1 to i32
    %c0_i32_24 = arith.constant 0 : i32
    %44 = arith.cmpi ne, %43, %c0_i32_24 : i32
    scf.if %44 {
      %c0_25 = arith.constant 0 : index
      %c0_26 = arith.constant 0 : index
      %45 = vector.load %arg13[%c0_25, %c0_26] : memref<8x128xf32, #tpu.memory_space<vmem>>, vector<8x128xf32>
      %c0_27 = arith.constant 0 : index
      %c0_28 = arith.constant 0 : index
      %46 = vector.load %arg11[%c0_27, %c0_28] : memref<8x128xf32, #tpu.memory_space<vmem>>, vector<8x128xf32>
      tpu.vector_store %arg11[%c0_27, %c0_28], %45 {strides = array<i32>} : memref<8x128xf32, #tpu.memory_space<vmem>>, vector<8x128xf32>,
      %c2_i32 = arith.constant 2 : i32
      %47 = arith.cmpi eq, %arg0, %c2_i32 : i32
      %48 = arith.extui %47 : i1 to i32
      %c0_i32_29 = arith.constant 0 : i32
      %49 = arith.cmpi ne, %48, %c0_i32_29 : i32
      scf.if %49 {
        %c0_30 = arith.constant 0 : index
        %c0_31 = arith.constant 0 : index
        %50 = vector.load %arg13[%c0_30, %c0_31] : memref<8x128xf32, #tpu.memory_space<vmem>>, vector<8x128xf32>
        %51 = math.tanh %50 : vector<8x128xf32>
        %c0_32 = arith.constant 0 : index
        %c0_33 = arith.constant 0 : index
        %52 = vector.load %arg10[%c0_32, %c0_33] : memref<8x128xf32, #tpu.memory_space<vmem>>, vector<8x128xf32>
        tpu.vector_store %arg10[%c0_32, %c0_33], %51 {strides = array<i32>} : memref<8x128xf32, #tpu.memory_space<vmem>>, vector<8x128xf32>,
      } else {
      }
    } else {
    }
    return
  }
  func.func @transform_0(%arg0: i32, %arg1: i32) -> (i32, i32) {
    %c0_i32 = arith.constant 0 : i32
    %c0_i32_0 = arith.constant 0 : i32
    %c0_i32_1 = arith.constant 0 : i32
    return %c0_i32, %c0_i32_0 : i32, i32
  }
  func.func @transform_1(%arg0: i32, %arg1: i32) -> (i32, i32) {
    %c0_i32 = arith.constant 0 : i32
    %c0_i32_0 = arith.constant 0 : i32
    return %arg1, %c0_i32 : i32, i32
  }
  func.func @transform_2(%arg0: i32, %arg1: i32) -> (i32, i32) {
    %c0_i32 = arith.constant 0 : i32
    %c0_i32_0 = arith.constant 0 : i32
    return %arg1, %c0_i32 : i32, i32
  }
  func.func @transform_3(%arg0: i32, %arg1: i32) -> (i32, i32) {
    %c0_i32 = arith.constant 0 : i32
    %c0_i32_0 = arith.constant 0 : i32
    return %arg1, %c0_i32 : i32, i32
  }
  func.func @transform_4(%arg0: i32, %arg1: i32) -> (i32, i32, i32) {
    %c0_i32 = arith.constant 0 : i32
    %c0_i32_0 = arith.constant 0 : i32
    %c0_i32_1 = arith.constant 0 : i32
    return %arg0, %c0_i32, %c0_i32_0 : i32, i32, i32
  }
  func.func @transform_5(%arg0: i32, %arg1: i32) -> (i32, i32, i32) {
    %c0_i32 = arith.constant 0 : i32
    %c0_i32_0 = arith.constant 0 : i32
    %c0_i32_1 = arith.constant 0 : i32
    return %arg0, %c0_i32, %c0_i32_0 : i32, i32, i32
  }
  func.func @transform_6(%arg0: i32, %arg1: i32) -> (i32, i32, i32) {
    %c0_i32 = arith.constant 0 : i32
    %c0_i32_0 = arith.constant 0 : i32
    %c0_i32_1 = arith.constant 0 : i32
    return %arg0, %c0_i32, %c0_i32_0 : i32, i32, i32
  }
  func.func @transform_7(%arg0: i32, %arg1: i32) -> (i32, i32, i32) {
    %c0_i32 = arith.constant 0 : i32
    %c0_i32_0 = arith.constant 0 : i32
    %c0_i32_1 = arith.constant 0 : i32
    return %arg0, %c0_i32, %c0_i32_0 : i32, i32, i32
  }
  func.func @transform_8(%arg0: i32, %arg1: i32) -> (i32, i32) {
    %c0_i32 = arith.constant 0 : i32
    %c0_i32_0 = arith.constant 0 : i32
    %c0_i32_1 = arith.constant 0 : i32
    return %c0_i32, %c0_i32_0 : i32, i32
  }
}

</mosaic_0001>

<bundles_post_ra>
// kernel: tpu_custom_call.1
= control target key start
LH: loop header
LB: loop body
LE: loop exit
PB: predicated region body
PF: predicated region fallthrough
CT: control target
= control target key end

     0   :  { %13 = vsyncpa [#allocation6], 0  ;;  %s3012_s0 = inlined_call_operand.vmem [shape: f32[8,128], index: 0, kind: input, shape index: {}]   ;;  %s3013_s1 = inlined_call_operand.vmem [shape: s32[128,1], index: 1, kind: input, shape index: {}]   ;;  %s3014_s2 = inlined_call_operand.vmem [shape: s32[128,1], index: 2, kind: input, shape index: {}]   ;;  %s3015_s3 = inlined_call_operand.vmem [shape: f32[128,8], index: 3, kind: input, shape index: {}]   ;;  %s3016_s4 = inlined_call_operand.hbm [shape: f32[3,128,384], index: 4, kind: input, shape index: {}]   ;;  %s3017_s5 = inlined_call_operand.vmem [shape: f32[3,8,128], index: 5, kind: input, shape index: {}]   ;;  %s3018_s6 = inlined_call_operand.vmem [shape: f32[3,1,128], index: 6, kind: input, shape index: {}]   ;;  %s3019_s7 = inlined_call_operand.vmem [shape: f32[3,1,128], index: 7, kind: input, shape index: {}]   ;;  %s3020_s8 = inlined_call_operand.hbm [shape: f32[8,128], index: 8, kind: output, shape index: {}]  }
   0x1   :  { %15 = vsyncpa [#allocation6 + $0x1], 0 }
   0x2   :  { %16 = vsyncpa [#allocation7], 0  ;;  %s2337_s27 = smov 0   ;;  %s2339_s28 = smov 0  }
   0x3   :  { %s2341_s29 = smov 0   ;;  %s2343_s30 = smov 0  }
   0x4   :  { %s2345_s9 = smov 0   ;;  %s2347_s10 = smov 0  }
   0x5 LB: > { %s3021_s11 = sadd.s32 4294967295, %s2282_s10   ;;  %s34_s12 = sadd.s32 1, %s2278_s9  ;;  %s2282_s10 = sphi %s2347_s10, %s22_s10   ;;  %s2278_s9 = sphi %s2345_s9, %s3030_s9   ;;  %s2274_s30 = sphi %s2343_s30, %s3029_s30   ;;  %s2270_s29 = sphi %s2341_s29, %s3028_s29   ;;  %s2266_s28 = sphi %s2339_s28, %s3027_s28   ;;  %s2262_s27 = sphi %s2337_s27, %s3026_s27  }
   0x6   : > { %p36_p0 = scmp.ge.s32.totalorder %s34_s12, 3  ;;  %s140_s13 = sadd.s32 1, %s2270_s29 }
   0x7   : > { %p147_p1 = scmp.ne.s32.totalorder %s2270_s29, %s2266_s28  ;;  %p148_p2 = scmp.eq.s32.totalorder %s2282_s10, 0 }
   0x8   : > { %s3032_s12 = smov (%p36_p0, %s34_s12), 0  ;;  %p153_p4 = scmp.ne.s32.totalorder %s2266_s28, %s2262_s27 }
   0x9   : > { %p149_p3 = por %p148_p2, %p147_p1  ;;  %s137_s14 = ssub.s32 %s2278_s9, %s3032_s12 }
   0xa   : > { %p154_p5 = scmp.eq.s32.totalorder %s3021_s11, 0  ;;  %p138_p6 = scmp.eq.s32.totalorder %s137_s14, 0 }
   0xb   : > { %p2110_p8 = scmp.lt.s32.totalorder %s2282_s10, 3  ;;  %s306_s17 = sand.u32 1, %s2270_s29  }
   0xc   : > { %p2378_p7 = por %p154_p5, %p153_p4  ;;  %s2098_s18 = smul.u32 6144, %s2278_s9 }
   0xd   : > { %s2384_s16 = scalar_select %p138_p6, %s2270_s29, %s140_s13  }
   0xe   : > { %s2097_s19 = smul.u32 384, %s306_s17  ;;  %s2391_s22 = scalar_lea.hbm %s3016_s4, %s2098_s18 }
   0xf   : > { %p2393_p9 = pnand %p2110_p8, %p149_p3  ;;  %s2399_s26 = scalar_lea.sflag [#allocation6], %s306_s17 }
  0x10   : > { %s310_s24 = scalar_lea.vmem [#allocation5], %s2097_s19  ;;  %s2172_s27 = scalar_lea.hbm %s2391_s22, 6144 }
  0x11   : > { %s317_s25 = sshll.u32 %s310_s24, 4  ;;  %p2173_p10 = scmp.ne.s32.totalorder %s2391_s22, %s2172_s27  ;;  %s2397_s25 = int_to_ptr.vmem [resolvable:$true] %s317_s25 }
  0x12   : > { %p2174_p11 = pneg %p2393_p9  ;;  %s2177_s18 = scalar_lea.hbm %s3016_s4, 18432 }
  0x13   : > { %p2178_p0 = scmp.lt.u32.totalorder %s2391_s22, %s3016_s4  ;;  %p2179_p1 = scmp.lt.u32.totalorder %s2177_s18, %s2172_s27 }
  0x14   : > { %p2175_p12 = pnand %p2174_p11, %p2173_p10  ;;  %p2181_p3 = scmp.lt.u32.totalorder %s2172_s27, %s2391_s22 }
  0x15   : > { %p2180_p2 = por %p2179_p1, %p2178_p0 }
  0x16   : > { %p2176_p13 = pneg %p2175_p12 }
  0x17   : > { %p2182_p4 = por %p2181_p3, %p2180_p2 }
  0x19   : > { %p2183_p5 = pnand %p2182_p4, %p2176_p13 }
  0x1b   : > { %2186 = shalt.err (!%p2183_p5)
}
  0x1c   : > { %s2187_s17 = scalar_lea.vmem %s2397_s25, 6144  ;;  %s2284_s19 = smov [#allocation5]  }
  0x1d   : > { %p2188_p6 = scmp.ne.s32.totalorder %s2397_s25, %s2187_s17  ;;  %s2192_s24 = sshll.u32 %s2284_s19, 4  ;;  %s2193_s24 = int_to_ptr.vmem [resolvable:$false] %s2192_s24 }
  0x1e   : > { %s2194_s13 = scalar_lea.vmem %s2193_s24, 12288  ;;  %p2195_p12 = scmp.lt.s32.totalorder %s2397_s25, %s2193_s24 }
  0x1f   : > { %p2190_p8 = pnand %p2188_p6, %p2174_p11  ;;  %p2196_p0 = scmp.lt.s32.totalorder %s2194_s13, %s2187_s17 }
  0x21   : > { %p2191_p10 = pneg %p2190_p8  ;;  %p2197_p1 = por %p2196_p0, %p2195_p12 }
  0x23   : > { %p2198_p2 = pnand %p2197_p1, %p2191_p10 }
  0x25   : > { %2201 = shalt.err (!%p2198_p2)
}
  0x26   : > { %s2285_s27 = smov 384   ;;  %s2286_s14 = smov 24  }
  0x27   : > { %2109 = dma.hbm_to_vmem [thread:$0]  (!%p2393_p9), %s2391_s22, 6144, %s2397_s25, %s2399_s26, %s2285_s27, %s2285_s27, %s2286_s14  }
  0x28   : > { %p1712_p11 = scmp.ge.s32.totalorder %s2282_s10, 1  ;;  %p344_p13 = scmp.lt.s32.totalorder %s2282_s10, 4 }
  0x2a   : > { %p345_p3 = pnand %p1712_p11, %p344_p13 }
  0x2b   : > { %s350_s18 = sand.u32 (!%p345_p3), 1, %s2266_s28  }
  0x2c   : > { %348 = sbr.rel (%p345_p3) target bundleno = 856 (0x358), region = 52  ;;  %s351_s21 = scalar_lea.sflag (!%p345_p3), [#allocation6], %s350_s18 }
  0x2d   : > { %s2099_s20 = smul.u32 (!%p345_p3), 384, %s350_s18 }
  0x2f   : > { %s2430_s17 = scalar_lea.vmem (!%p345_p3), [#allocation5], %s2099_s20 }
  0x33   : > { %2253 = dma.done.wait (%p2378_p7), %s351_s21, 6144  }
  0x34   : > { %2255 = vsyncadd (%p2378_p7), %s351_s21, 4294961152  ;;  %p425_p4 = scmp.lt.s32.totalorder %s2274_s30, 2  ;;  %p1714_p7 = scmp.ne.s32.totalorder %s2274_s30, 0 }
  0x35   : > { %v444_v0 = vld [vmem:[%s3012_s0] sm:$0xff] (!%p1714_p7) }
  0x36   : > { %s2438_s22 = scalar_select %p425_p4, %s2274_s30, 2 }
  0x37   : > { %443 = sbr.rel (%p1714_p7) target bundleno = 62 (0x3e), region = 64  ;;  %445 = vst [vmem:[#allocation2] sm:$0xff] (!%p1714_p7), %v444_v0 }
  0x38   : > { %s1713_s23 = sshll.u32 %s2438_s22, 3  ;;  %s431_s19 = scalar_lea.vmem %s3018_s6, %s2438_s22 }
  0x39   : > { %s2448_s27 = scalar_lea.vmem %s3017_s5, %s1713_s23  ;;  %s434_s18 = scalar_lea.vmem %s3019_s7, %s2438_s22 }
  0x3e PF: > { %v448_v1 = vld [vmem:[%s2430_s17 + $0x8] sm:$0xff]  ;;  %v451_v2 = vld [vmem:[%s2430_s17 + $0x20] sm:$0xff]  ;;  %v450_v5 = vld [vmem:[%s2430_s17 + $0x18] sm:$0xff]  ;;  %v2287_v8 = vmov 0   ;;  %v2288_v14 = vmov 0.0   ;;  %vm2290_vm0 = vmmov 0  }
  0x3f   : > { %v447_v3 = vld [vmem:[%s2430_s17] sm:$0xff]  ;;  %v1991_v4 = vpack.c.bf16 %v451_v2, %v448_v1  ;;  %v454_v6 = vld [vmem:[%s2430_s17 + $0x38] sm:$0xff]  ;;  %v457_v7 = vld [vmem:[%s2430_s17 + $0x50] sm:$0xff]  ;;  %2168 = vset.pattern.permute.xlu0 %v2287_v8  ;;  %2169 = vset.pattern.permute.xlu1 %v2287_v8  ;;  %vm900_vm4 = vcmask 64512   ;;  %p1783_p9 = scmp.ne.s32.totalorder %s2274_s30, 2 }
  0x40   : > { %v1993_v9 = vpack.c.bf16 %v450_v5, %v447_v3  ;;  %v1995_v10 = vpack.c.bf16 %v457_v7, %v454_v6  ;;  %v453_v11 = vld [vmem:[%s2430_s17 + $0x30] sm:$0xff]  ;;  %v456_v12 = vld [vmem:[%s2430_s17 + $0x48] sm:$0xff]  ;;  %559 = vmatprep.mubr.f32.mxu0 %v2288_v14  ;;  %v463_v15 = vld [vmem:[%s2430_s17 + $0x80] sm:$0xff]  ;;  %1891 = vmatprep.mubr.msk.f32.mxu1 %vm2290_vm0, %v2288_v14 }
  0x41   : > { %v460_v13 = vld [vmem:[%s2430_s17 + $0x68] sm:$0xff]  ;;  %1992 = vmatprep.subr.bf16.mxu0 %v1991_v4  ;;  %v1997_v16 = vpack.c.bf16 %v456_v12, %v453_v11  ;;  %v459_v18 = vld [vmem:[%s2430_s17 + $0x60] sm:$0xff]  ;;  %v462_v19 = vld [vmem:[%s2430_s17 + $0x78] sm:$0xff] }
  0x42   : > { %1994 = vmatpush1.bf16.msra.mxu0 %v1993_v9  ;;  %v1999_v17 = vpack.c.bf16 %v463_v15, %v460_v13  ;;  %v654_v20 = vld [vmem:[%s3013_s1] sm:$0xff]  ;;  %v466_v21 = vld [vmem:[%s2430_s17 + $0x98] sm:$0xff]  ;;  %v656_v23 = vld [vmem:[%s3013_s1 + $0x10] sm:$0xff]  ;;  %v2001_v25 = vpack.c.bf16 %v462_v19, %v459_v18 }
  0x43   : > { %1996 = vmatprep.subr.bf16.mxu0 %v1995_v10  ;;  %v469_v22 = vld [vmem:[%s2430_s17 + $0xb0] sm:$0xff]  ;;  %689 = vperm.xlu0 %2168, %v654_v20   ;;  %v655_v24 = vld [vmem:[%s3013_s1 + $0x8] sm:$0xff]  ;;  %v468_v28 = vld [vmem:[%s2430_s17 + $0xa8] sm:$0xff] }
  0x44   : > { %695 = vperm.xlu1 %2169, %v656_v23   ;;  %v2003_v26 = vpack.c.bf16 %v469_v22, %v466_v21  ;;  %v465_v27 = vld [vmem:[%s2430_s17 + $0x90] sm:$0xff]  ;;  %v657_v29 = vld [vmem:[%s3013_s1 + $0x18] sm:$0xff]  ;;  %v475_v31 = vld [vmem:[%s2430_s17 + $0xe0] sm:$0xff]  ;;  %v2289_v23 = vmov 0.0|0.0  }
  0x45   : > { %v472_v30 = vld [vmem:[%s2430_s17 + $0xc8] sm:$0xff]  ;;  %v658_v32 = vld [vmem:[%s3013_s1 + $0x20] sm:$0xff]  ;;  %v2005_v33 = vpack.c.bf16 %v468_v28, %v465_v27  ;;  %v471_v35 = vld [vmem:[%s2430_s17 + $0xc0] sm:$0xff]  ;;  %2023 = vmatprep.subr.bf16.mxu1 %v2289_v23 }
  0x46   : > { %1998 = vmatpush1.bf16.msra.mxu0 %v1997_v16  ;;  %v2007_v34 = vpack.c.bf16 %v475_v31, %v472_v30  ;;  %v474_v36 = vld [vmem:[%s2430_s17 + $0xd8] sm:$0xff]  ;;  %v481_v39 = vld [vmem:[%s2430_s17 + $0x110] sm:$0xff]  ;;  %v660_v40 = vld [vmem:[%s3013_s1 + $0x30] sm:$0xff] }
  0x47   : > { %2000 = vmatprep.subr.bf16.mxu0 %v1999_v17  ;;  %692 = vperm.xlu0 %2168, %v655_v24   ;;  %v659_v37 = vld [vmem:[%s3013_s1 + $0x28] sm:$0xff]  ;;  %v2009_v41 = vpack.c.bf16 %v474_v36, %v471_v35  ;;  %v477_v43 = vld [vmem:[%s2430_s17 + $0xf0] sm:$0xff]  ;;  %v480_v44 = vld [vmem:[%s2430_s17 + $0x108] sm:$0xff] }
  0x48   : > { %698 = vperm.xlu1 %2169, %v657_v29   ;;  %v478_v38 = vld [vmem:[%s2430_s17 + $0xf8] sm:$0xff]  ;;  %v661_v45 = vld [vmem:[%s3013_s1 + $0x38] sm:$0xff]  ;;  %v487_v47 = vld [vmem:[%s2430_s17 + $0x140] sm:$0xff]  ;;  %v2013_v49 = vpack.c.bf16 %v480_v44, %v477_v43 }
  0x49   : > { %v2011_v42 = vpack.c.bf16 %v481_v39, %v478_v38  ;;  %v484_v46 = vld [vmem:[%s2430_s17 + $0x128] sm:$0xff]  ;;  %v662_v48 = vld [vmem:[%s3013_s1 + $0x40] sm:$0xff]  ;;  %v483_v51 = vld [vmem:[%s2430_s17 + $0x120] sm:$0xff] }
  0x4a   : > { %2002 = vmatpush1.bf16.msra.mxu0 %v2001_v25  ;;  %v2015_v50 = vpack.c.bf16 %v487_v47, %v484_v46  ;;  %v486_v52 = vld [vmem:[%s2430_s17 + $0x138] sm:$0xff]  ;;  %v493_v55 = vld [vmem:[%s2430_s17 + $0x170] sm:$0xff]  ;;  %v664_v56 = vld [vmem:[%s3013_s1 + $0x50] sm:$0xff]  ;;  %v686_v46 = vlaneseq }
  0x4b   : > { %2004 = vmatprep.subr.bf16.mxu0 %v2003_v26  ;;  %701 = vperm.xlu0 %2168, %v658_v32   ;;  %v663_v53 = vld [vmem:[%s3013_s1 + $0x48] sm:$0xff]  ;;  %v2017_v57 = vpack.c.bf16 %v486_v52, %v483_v51  ;;  %v489_v59 = vld [vmem:[%s2430_s17 + $0x150] sm:$0xff]  ;;  %v492_v60 = vld [vmem:[%s2430_s17 + $0x168] sm:$0xff] }
  0x4c   : > { %704 = vperm.xlu1 %2169, %v659_v37   ;;  %v490_v54 = vld [vmem:[%s2430_s17 + $0x158] sm:$0xff]  ;;  %v665_v61 = vld [vmem:[%s3013_s1 + $0x58] sm:$0xff]  ;;  %v666_v62 = vld [vmem:[%s3013_s1 + $0x60] sm:$0xff]  ;;  %v2021_v63 = vpack.c.bf16 %v492_v60, %v489_v59  ;;  %v2617_v47 = vand.u32 127, %v686_v46 }
  0x4d   : > { %v2019_v58 = vpack.c.bf16 %v493_v55, %v490_v54  ;;  %v667_v0 = vld [vmem:[%s3013_s1 + $0x68] sm:$0xff]  ;;  %v668_v1 = vld [vmem:[%s3013_s1 + $0x70] sm:$0xff]  ;;  %v2536_v2 = vld [vmem:[#allocation2] sm:$0xff] }
  0x4e   : > { %2006 = vmatpush1.bf16.msra.mxu0 %v2005_v33  ;;  %v669_v3 = vld [vmem:[%s3013_s1 + $0x78] sm:$0xff]  ;;  %v670_v4 = vld [vmem:[%s3014_s2] sm:$0xff]  ;;  %v671_v5 = vld [vmem:[%s3014_s2 + $0x8] sm:$0xff] }
  0x4f   : > { %2008 = vmatprep.subr.bf16.mxu0 %v2007_v34  ;;  %707 = vperm.xlu0 %2168, %v660_v40   ;;  %v672_v6 = vld [vmem:[%s3014_s2 + $0x10] sm:$0xff]  ;;  %v673_v7 = vld [vmem:[%s3014_s2 + $0x18] sm:$0xff]  ;;  %v674_v8 = vld [vmem:[%s3014_s2 + $0x20] sm:$0xff] }
  0x50   : > { %710 = vperm.xlu1 %2169, %v661_v45   ;;  %v675_v9 = vld [vmem:[%s3014_s2 + $0x28] sm:$0xff]  ;;  %v676_v10 = vld [vmem:[%s3014_s2 + $0x30] sm:$0xff]  ;;  %v677_v11 = vld [vmem:[%s3014_s2 + $0x38] sm:$0xff] }
  0x51   : > { %v678_v12 = vld [vmem:[%s3014_s2 + $0x40] sm:$0xff]  ;;  %v679_v13 = vld [vmem:[%s3014_s2 + $0x48] sm:$0xff]  ;;  %v680_v15 = vld [vmem:[%s3014_s2 + $0x50] sm:$0xff] }
  0x52   : > { %2010 = vmatpush1.bf16.msra.mxu0 %v2009_v41  ;;  %v681_v16 = vld [vmem:[%s3014_s2 + $0x58] sm:$0xff]  ;;  %v682_v17 = vld [vmem:[%s3014_s2 + $0x60] sm:$0xff]  ;;  %v683_v18 = vld [vmem:[%s3014_s2 + $0x68] sm:$0xff] }
  0x53   : > { %2012 = vmatprep.subr.bf16.mxu0 %v2011_v42  ;;  %713 = vperm.xlu0 %2168, %v662_v48   ;;  %v684_v19 = vld [vmem:[%s3014_s2 + $0x70] sm:$0xff]  ;;  %v685_v20 = vld [vmem:[%s3014_s2 + $0x78] sm:$0xff]  ;;  %v449_v21 = vld [vmem:[%s2430_s17 + $0x10] sm:$0xff] }
  0x54   : > { %716 = vperm.xlu1 %2169, %v663_v53   ;;  %v452_v22 = vld [vmem:[%s2430_s17 + $0x28] sm:$0xff]  ;;  %v455_v25 = vld [vmem:[%s2430_s17 + $0x40] sm:$0xff]  ;;  %v458_v26 = vld [vmem:[%s2430_s17 + $0x58] sm:$0xff] }
  0x55   : > { %v2024_v24 = vpack.c.bf16 %v452_v22, %v449_v21  ;;  %v2027_v27 = vpack.c.bf16 %v458_v26, %v455_v25  ;;  %v461_v28 = vld [vmem:[%s2430_s17 + $0x70] sm:$0xff]  ;;  %v464_v29 = vld [vmem:[%s2430_s17 + $0x88] sm:$0xff]  ;;  %v467_v31 = vld [vmem:[%s2430_s17 + $0xa0] sm:$0xff] }
  0x56   : > { %2014 = vmatpush1.bf16.msra.mxu0 %v2013_v49  ;;  %v2030_v30 = vpack.c.bf16 %v464_v29, %v461_v28  ;;  %v470_v32 = vld [vmem:[%s2430_s17 + $0xb8] sm:$0xff]  ;;  %v473_v34 = vld [vmem:[%s2430_s17 + $0xd0] sm:$0xff]  ;;  %v476_v35 = vld [vmem:[%s2430_s17 + $0xe8] sm:$0xff] }
  0x57   : > { %2016 = vmatprep.subr.bf16.mxu0 %v2015_v50  ;;  %719 = vperm.xlu0 %2168, %v664_v56   ;;  %v2033_v33 = vpack.c.bf16 %v470_v32, %v467_v31  ;;  %v2036_v36 = vpack.c.bf16 %v476_v35, %v473_v34  ;;  %v479_v37 = vld [vmem:[%s2430_s17 + $0x100] sm:$0xff]  ;;  %v482_v38 = vld [vmem:[%s2430_s17 + $0x118] sm:$0xff]  ;;  %v485_v40 = vld [vmem:[%s2430_s17 + $0x130] sm:$0xff] }
  0x58   : > { %722 = vperm.xlu1 %2169, %v665_v61   ;;  %2025 = vmatpush3.bf16.msra.mxu1 %v2024_v24  ;;  %v2039_v39 = vpack.c.bf16 %v482_v38, %v479_v37  ;;  %v488_v41 = vld [vmem:[%s2430_s17 + $0x148] sm:$0xff]  ;;  %v491_v43 = vld [vmem:[%s2430_s17 + $0x160] sm:$0xff]  ;;  %v494_v44 = vld [vmem:[%s2430_s17 + $0x178] sm:$0xff] }
  0x59   : > { %2026 = vmatprep.subr.bf16.mxu1 %v2289_v23  ;;  %v2042_v42 = vpack.c.bf16 %v488_v41, %v485_v40  ;;  %v2045_v45 = vpack.c.bf16 %v494_v44, %v491_v43 }
  0x5a   : > { %2018 = vmatpush1.bf16.msra.mxu0 %v2017_v57 }
  0x5b   : > { %2020 = vmatprep.subr.bf16.mxu0 %v2019_v58  ;;  %725 = vperm.xlu0 %2168, %v666_v62  }
  0x5c   : > { %728 = vperm.xlu1 %2169, %v667_v0   ;;  %2028 = vmatpush3.bf16.msra.mxu1 %v2027_v27 }
  0x5d   : > { %2029 = vmatprep.subr.bf16.mxu1 %v2289_v23 }
  0x5e   : > { %2022 = vmatpush1.bf16.msra.mxu0 %v2021_v63 }
  0x5f   : > { %731 = vperm.xlu0 %2168, %v668_v1  }
  0x60   : > { %734 = vperm.xlu1 %2169, %v669_v3   ;;  %2031 = vmatpush3.bf16.msra.mxu1 %v2030_v30 }
  0x61   : > { %560 = vmatmul.mubr.f32.vlgmr.msra.gmra.mrb[0].mxu0 %v2536_v2  ;;  %2032 = vmatprep.subr.bf16.mxu1 %v2289_v23 }
  0x63   : > { %753 = vperm.xlu0 %2168, %v670_v4  }
  0x64   : > { %756 = vperm.xlu1 %2169, %v671_v5   ;;  %2034 = vmatpush3.bf16.msra.mxu1 %v2033_v33 }
  0x65   : > { %2035 = vmatprep.subr.bf16.mxu1 %v2289_v23 }
  0x67   : > { %759 = vperm.xlu0 %2168, %v672_v6  }
  0x68   : > { %762 = vperm.xlu1 %2169, %v673_v7   ;;  %2037 = vmatpush3.bf16.msra.mxu1 %v2036_v36 }
  0x69   : > { %2038 = vmatprep.subr.bf16.mxu1 %v2289_v23 }
  0x6b   : > { %765 = vperm.xlu0 %2168, %v674_v8  }
  0x6c   : > { %768 = vperm.xlu1 %2169, %v675_v9   ;;  %2040 = vmatpush3.bf16.msra.mxu1 %v2039_v39 }
  0x6d   : > { %2041 = vmatprep.subr.bf16.mxu1 %v2289_v23 }
  0x6f   : > { %771 = vperm.xlu0 %2168, %v676_v10  }
  0x70   : > { %774 = vperm.xlu1 %2169, %v677_v11   ;;  %2043 = vmatpush3.bf16.msra.mxu1 %v2042_v42 }
  0x71   : > { %2044 = vmatprep.subr.bf16.mxu1 %v2289_v23 }
  0x73   : > { %777 = vperm.xlu0 %2168, %v678_v12  }
  0x74   : > { %780 = vperm.xlu1 %2169, %v679_v13   ;;  %2046 = vmatpush3.bf16.msra.mxu1 %v2045_v45 }
  0x77   : > { %783 = vperm.xlu0 %2168, %v680_v15   ;;  %1892 = vmatmul.mubr.f32.vlgmr.msra.gmra.mrb[0].mxu1 %v2536_v2 }
  0x78   : > { %786 = vperm.xlu1 %2169, %v681_v16  }
  0x7b   : > { %789 = vperm.xlu0 %2168, %v682_v17  }
  0x7c   : > { %792 = vperm.xlu1 %2169, %v683_v18  }
  0x7f   : > { %795 = vperm.xlu0 %2168, %v684_v19  }
  0x80   : > { %798 = vperm.xlu1 %2169, %v685_v20  }
  0xc2   : > { %v690_v48 = vpop.permute.xlu0 %689 }
  0xc3   : > { %vm736_vm1 = vcmp.eq.s32.totalorder %v690_v48, %v2617_v47  ;;  %v696_v49 = vpop.permute.xlu1 %695 }
  0xc4   : > { %vm738_vm2 = vcmp.eq.s32.totalorder %v696_v49, %v2617_v47  ;;  %v1733_v50 = vsel %vm736_vm1, 1.0, %v2288_v14 }
  0xc5   : > { %v2624_v52 = vsel %vm738_vm2, 1.0, %v2288_v14 }
  0xc6   : > { %v693_v51 = vpop.permute.xlu0 %692 }
  0xc7   : > { %vm737_vm3 = vcmp.eq.s32.totalorder %v693_v51, %v2617_v47  ;;  %v699_v54 = vpop.permute.xlu1 %698 }
  0xc8   : > { %v1734_v53 = vsel %vm737_vm3, 1.0, %v2288_v14  ;;  %vm739_vm5 = vcmp.eq.s32.totalorder %v699_v54, %v2617_v47 }
  0xc9   : > { %v889_v55 = vpack.c.bf16 %v1734_v53, %v1733_v50  ;;  %v2629_v56 = vsel %vm739_vm5, 1.0, %v2288_v14 }
  0xca   : > { %v702_v57 = vpop.permute.xlu0 %701  ;;  %v890_v58 = vpack.c.bf16 %v2629_v56, %v2624_v52  ;;  %v1151_v52 = vld [vmem:[%s3015_s3 + $0x8] sm:$0xff]  ;;  %v1152_v56 = vld [vmem:[%s3015_s3 + $0x10] sm:$0xff] }
  0xcb   : > { %vm740_vm6 = vcmp.eq.s32.totalorder %v702_v57, %v2617_v47  ;;  %1896 = vmatprep.mubr.msk.bf16.mxu0 %vm900_vm4, %v889_v55  ;;  %v705_v60 = vpop.permute.xlu1 %704 }
  0xcc   : > { %v2636_v59 = vsel %vm740_vm6, 1.0, %v2288_v14  ;;  %vm741_vm7 = vcmp.eq.s32.totalorder %v705_v60, %v2617_v47 }
  0xcd   : > { %v2640_v61 = vsel %vm741_vm7, 1.0, %v2288_v14 }
  0xce   : > { %v708_v62 = vpop.permute.xlu0 %707  ;;  %v891_v63 = vpack.c.bf16 %v2640_v61, %v2636_v59  ;;  %v1154_v59 = vld [vmem:[%s3015_s3 + $0x20] sm:$0xff]  ;;  %v1155_v61 = vld [vmem:[%s3015_s3 + $0x28] sm:$0xff] }
  0xcf   : > { %vm742_vm8 = vcmp.eq.s32.totalorder %v708_v62, %v2617_v47  ;;  %v711_v1 = vpop.permute.xlu1 %710 }
  0xd0   : > { %v2646_v0 = vsel %vm742_vm8, 1.0, %v2288_v14  ;;  %vm743_vm9 = vcmp.eq.s32.totalorder %v711_v1, %v2617_v47 }
  0xd1   : > { %v2650_v2 = vsel %vm743_vm9, 1.0, %v2288_v14 }
  0xd2   : > { %v714_v3 = vpop.permute.xlu0 %713  ;;  %v892_v4 = vpack.c.bf16 %v2650_v2, %v2646_v0  ;;  %v1157_v0 = vld [vmem:[%s3015_s3 + $0x38] sm:$0xff]  ;;  %v1158_v2 = vld [vmem:[%s3015_s3 + $0x40] sm:$0xff] }
  0xd3   : > { %vm744_vm10 = vcmp.eq.s32.totalorder %v714_v3, %v2617_v47  ;;  %v717_v6 = vpop.permute.xlu1 %716 }
  0xd4   : > { %v2656_v5 = vsel %vm744_vm10, 1.0, %v2288_v14  ;;  %vm745_vm11 = vcmp.eq.s32.totalorder %v717_v6, %v2617_v47 }
  0xd5   : > { %v2660_v7 = vsel %vm745_vm11, 1.0, %v2288_v14 }
  0xd6   : > { %v720_v8 = vpop.permute.xlu0 %719  ;;  %v893_v9 = vpack.c.bf16 %v2660_v7, %v2656_v5  ;;  %v1160_v5 = vld [vmem:[%s3015_s3 + $0x50] sm:$0xff]  ;;  %v1161_v7 = vld [vmem:[%s3015_s3 + $0x58] sm:$0xff] }
  0xd7   : > { %vm746_vm12 = vcmp.eq.s32.totalorder %v720_v8, %v2617_v47  ;;  %v723_v11 = vpop.permute.xlu1 %722 }
  0xd8   : > { %v2666_v10 = vsel %vm746_vm12, 1.0, %v2288_v14  ;;  %vm747_vm13 = vcmp.eq.s32.totalorder %v723_v11, %v2617_v47 }
  0xd9   : > { %v2670_v12 = vsel %vm747_vm13, 1.0, %v2288_v14 }
  0xda   : > { %v726_v13 = vpop.permute.xlu0 %725  ;;  %v894_v15 = vpack.c.bf16 %v2670_v12, %v2666_v10  ;;  %v1163_v10 = vld [vmem:[%s3015_s3 + $0x68] sm:$0xff]  ;;  %v1164_v12 = vld [vmem:[%s3015_s3 + $0x70] sm:$0xff] }
  0xdb   : > { %vm748_vm14 = vcmp.eq.s32.totalorder %v726_v13, %v2617_v47  ;;  %v729_v17 = vpop.permute.xlu1 %728 }
  0xdc   : > { %v1745_v16 = vsel %vm748_vm14, 1.0, %v2288_v14  ;;  %vm749_vm15 = vcmp.eq.s32.totalorder %v729_v17, %v2617_v47 }
  0xdd   : > { %v1746_v18 = vsel %vm749_vm15, 1.0, %v2288_v14 }
  0xde   : > { %v732_v19 = vpop.permute.xlu0 %731  ;;  %v895_v20 = vpack.c.bf16 %v1746_v18, %v1745_v16 }
  0xdf   : > { %vm750_vm1 = vcmp.eq.s32.totalorder %v732_v19, %v2617_v47  ;;  %v735_v22 = vpop.permute.xlu1 %734 }
  0xe0   : > { %v2680_v21 = vsel %vm750_vm1, 1.0, %v2288_v14  ;;  %vm751_vm2 = vcmp.eq.s32.totalorder %v735_v22, %v2617_v47  ;;  %1908 = vmatprep.mubr.msk.bf16.mxu1 %vm900_vm4, %v895_v20 }
  0xe1   : > { %v2685_v24 = vsel %vm751_vm2, 1.0, %v2288_v14 }
  0xe2   : > { %v754_v25 = vpop.permute.xlu0 %753  ;;  %v896_v26 = vpack.c.bf16 %v2685_v24, %v2680_v21 }
  0xe3   : > { %vm800_vm3 = vcmp.eq.s32.totalorder %v754_v25, %v2617_v47  ;;  %v757_v28 = vpop.permute.xlu1 %756  ;;  %v1166_v25 = vld [vmem:[%s2448_s27] sm:$0xff] }
  0xe4   : > { %v2691_v27 = vsel %vm800_vm3, 1.0, %v2288_v14  ;;  %vm801_vm5 = vcmp.eq.s32.totalorder %v757_v28, %v2617_v47 }
  0xe5   : > { %1448 = vxpose.xlu0.b32.start [1/16] (narrow) %v2691_v27, 8  ;;  %v2696_v29 = vsel %vm801_vm5, 1.0, %v2288_v14 }
  0xe6   : > { %v760_v30 = vpop.permute.xlu0 %759  ;;  %v849_v31 = vpack.c.bf16 %v2696_v29, %v2691_v27 }
  0xe7   : > { %vm802_vm6 = vcmp.eq.s32.totalorder %v760_v30, %v2617_v47  ;;  %v763_v32 = vpop.permute.xlu1 %762  ;;  %v1150_v30 = vld [vmem:[%s3015_s3] sm:$0xff] }
  0xe8   : > { %vm803_vm7 = vcmp.eq.s32.totalorder %v763_v32, %v2617_v47  ;;  %v2704_v33 = vsel %vm802_vm6, 1.0, %v2288_v14  ;;  %vm925_vm6 = vcmask 1043456  }
  0xe9   : > { %1449 = vxpose.xlu0.b32.cont [2/16] (narrow) %v2696_v29, 8  ;;  %v2707_v34 = vsel %vm803_vm7, 1.0, %v2288_v14 }
  0xea   : > { %v766_v35 = vpop.permute.xlu0 %765  ;;  %v850_v36 = vpack.c.bf16 %v2707_v34, %v2704_v33 }
  0xeb   : > { %vm804_vm8 = vcmp.eq.s32.totalorder %v766_v35, %v2617_v47  ;;  %v769_v37 = vpop.permute.xlu1 %768 }
  0xec   : > { %vm805_vm9 = vcmp.eq.s32.totalorder %v769_v37, %v2617_v47  ;;  %v2715_v38 = vsel %vm804_vm8, 1.0, %v2288_v14 }
  0xed   : > { %1450 = vxpose.xlu0.b32.cont [3/16] (narrow) %v2704_v33, 8  ;;  %v2718_v39 = vsel %vm805_vm9, 1.0, %v2288_v14 }
  0xee   : > { %v772_v40 = vpop.permute.xlu0 %771  ;;  %v851_v41 = vpack.c.bf16 %v2718_v39, %v2715_v38 }
  0xef   : > { %vm806_vm10 = vcmp.eq.s32.totalorder %v772_v40, %v2617_v47  ;;  %v775_v42 = vpop.permute.xlu1 %774 }
  0xf0   : > { %vm807_vm11 = vcmp.eq.s32.totalorder %v775_v42, %v2617_v47  ;;  %v2726_v43 = vsel %vm806_vm10, 1.0, %v2288_v14 }
  0xf1   : > { %1451 = vxpose.xlu0.b32.cont [4/16] (narrow) %v2707_v34, 8  ;;  %v2729_v44 = vsel %vm807_vm11, 1.0, %v2288_v14 }
  0xf2   : > { %v778_v45 = vpop.permute.xlu0 %777  ;;  %v852_v46 = vpack.c.bf16 %v2729_v44, %v2726_v43 }
  0xf3   : > { %vm808_vm12 = vcmp.eq.s32.totalorder %v778_v45, %v2617_v47  ;;  %v781_v48 = vpop.permute.xlu1 %780 }
  0xf4   : > { %vm809_vm13 = vcmp.eq.s32.totalorder %v781_v48, %v2617_v47  ;;  %v2737_v49 = vsel %vm808_vm12, 1.0, %v2288_v14 }
  0xf5   : > { %1452 = vxpose.xlu0.b32.cont [5/16] (narrow) %v2715_v38, 8  ;;  %v2740_v50 = vsel %vm809_vm13, 1.0, %v2288_v14 }
  0xf6   : > { %v784_v51 = vpop.permute.xlu0 %783  ;;  %v853_v53 = vpack.c.bf16 %v2740_v50, %v2737_v49 }
  0xf7   : > { %vm810_vm14 = vcmp.eq.s32.totalorder %v784_v51, %v2617_v47  ;;  %v787_v54 = vpop.permute.xlu1 %786 }
  0xf8   : > { %vm811_vm15 = vcmp.eq.s32.totalorder %v787_v54, %v2617_v47  ;;  %v2748_v55 = vsel %vm810_vm14, 1.0, %v2288_v14 }
  0xf9   : > { %1453 = vxpose.xlu0.b32.cont [6/16] (narrow) %v2718_v39, 8  ;;  %v2751_v57 = vsel %vm811_vm15, 1.0, %v2288_v14  ;;  %v2922_v39 = vld [vmem:[%s431_s19] ss:$0 sm:$0xff] }
  0xfa   : > { %v790_v60 = vpop.permute.xlu0 %789  ;;  %v854_v62 = vpack.c.bf16 %v2751_v57, %v2748_v55 }
  0xfb   : > { %vm812_vm1 = vcmp.eq.s32.totalorder %v790_v60, %v2617_v47  ;;  %v793_v1 = vpop.permute.xlu1 %792 }
  0xfc   : > { %vm813_vm2 = vcmp.eq.s32.totalorder %v793_v1, %v2617_v47  ;;  %v2759_v3 = vsel %vm812_vm1, 1.0, %v2288_v14 }
  0xfd   : > { %1454 = vxpose.xlu0.b32.cont [7/16] (narrow) %v2726_v43, 8  ;;  %v2762_v6 = vsel %vm813_vm2, 1.0, %v2288_v14 }
  0xfe   : > { %v796_v8 = vpop.permute.xlu0 %795  ;;  %v855_v11 = vpack.c.bf16 %v2762_v6, %v2759_v3 }
  0xff   : > { %vm814_vm3 = vcmp.eq.s32.totalorder %v796_v8, %v2617_v47  ;;  %v799_v13 = vpop.permute.xlu1 %798 }
 0x100   : > { %vm815_vm5 = vcmp.eq.s32.totalorder %v799_v13, %v2617_v47  ;;  %v2770_v16 = vsel %vm814_vm3, 1.0, %v2288_v14 }
 0x101   : > { %1455 = vxpose.xlu0.b32.cont [8/16] (narrow) %v2729_v44, 8  ;;  %v2773_v17 = vsel %vm815_vm5, 1.0, %v2288_v14 }
 0x102   : > { %v856_v18 = vpack.c.bf16 %v2773_v17, %v2770_v16 }
 0x105   : > { %1456 = vxpose.xlu0.b32.cont [9/16] (narrow) %v2737_v49, 8 }
 0x109   : > { %1457 = vxpose.xlu0.b32.cont [10/16] (narrow) %v2740_v50, 8 }
 0x10d   : > { %1458 = vxpose.xlu0.b32.cont [11/16] (narrow) %v2748_v55, 8 }
 0x111   : > { %1459 = vxpose.xlu0.b32.cont [12/16] (narrow) %v2751_v57, 8 }
 0x115   : > { %1460 = vxpose.xlu0.b32.cont [13/16] (narrow) %v2759_v3, 8 }
 0x119   : > { %1461 = vxpose.xlu0.b32.cont [14/16] (narrow) %v2762_v6, 8 }
 0x11d   : > { %1462 = vxpose.xlu0.b32.cont [15/16] (narrow) %v2770_v16, 8 }
 0x121   : > { %1463 = vxpose.xlu0.b32.end [16/16] (narrow) %v2773_v17, 8 }
 0x134   : > { %v561_v47 = vpop.f32.mrb[0].mxu0 }
 0x135   : > { %v563_v19 = vpop.f32.mrb[1].mxu0 }
 0x136   : > { %v1788_v20 = vpack.c.bf16 %v563_v19, %v561_v47  ;;  %v1789_v22 = vpack.c.bf16 %v563_v19, %v563_v19 }
 0x138   : > { %2094 = vmatprep.subr.msk.bf16.mxu0 %vm925_vm6, %v1789_v22  ;;  %2095 = vmatprep.subr.msk.bf16.mxu1 %vm925_vm6, %v1789_v22  ;;  %v927_v28 = vsel %vm925_vm6, %v1789_v22, 0  ;;  %v1051_v32 = vsel %vm925_vm6, %v1788_v20, 0 }
 0x139   : > { %1895 = vmatpush3.bf16.msra.mxu0 %v927_v28  ;;  %2072 = vmatpush3.bf16.msra.mxu1 %v927_v28 }
 0x13a   : > { %2096 = vmatprep.subr.msk.bf16.mxu0 %vm925_vm6, %v1788_v20  ;;  %1930 = vmatprep.subr.mxu1 %v1166_v25 }
 0x13c   : > { %1897 = vmatmul.mubr.msk.bf16.vlgmr.msra.gmra.mrb[4].mxu0 %vm900_vm4, %v890_v58  ;;  %1909 = vmatmul.mubr.msk.bf16.vlgmr.msra.gmra.mrb[4].mxu1 %vm900_vm4, %v896_v26  ;;  %v1153_v58 = vld [vmem:[%s3015_s3 + $0x18] sm:$0xff] }
 0x13d   : > { %1900 = vmatprep.mubr.msk.bf16.mxu0 %vm900_vm4, %v891_v63  ;;  %1913 = vmatpush3.bf16.msra.mxu0 %v1051_v32  ;;  %v1156_v63 = vld [vmem:[%s3015_s3 + $0x30] sm:$0xff] }
 0x13e   : > { %1931 = vmatpush3.msra.mxu1 %v1166_v25  ;;  %1932 = vmatprep.mubr.msk.f32.mxu1 %vm900_vm4, %v1150_v30 }
 0x13f   : > { %2047 = vmatprep.subr.bf16.mxu1 %v2289_v23 }
 0x144   : > { %1901 = vmatmul.mubr.msk.bf16.gmra.mrb[8].mxu0 %vm900_vm4, %v892_v4  ;;  %1933 = vmatmul.mubr.msk.f32.vlgmr.msra.gmra.mrb[2].mxu1 %vm900_vm4, %v1151_v52  ;;  %v1159_v4 = vld [vmem:[%s3015_s3 + $0x48] sm:$0xff] }
 0x145   : > { %1904 = vmatprep.mubr.msk.bf16.mxu0 %vm900_vm4, %v893_v9  ;;  %1935 = vmatprep.mubr.msk.f32.mxu1 %vm900_vm4, %v1152_v56  ;;  %v1162_v9 = vld [vmem:[%s3015_s3 + $0x60] sm:$0xff] }
 0x148   : > { %1936 = vmatmul.mubr.msk.f32.gmra.mrb[8].mxu1 %vm900_vm4, %v1153_v58 }
 0x149   : > { %1938 = vmatprep.mubr.msk.f32.mxu1 %vm900_vm4, %v1154_v59 }
 0x14c   : > { %1905 = vmatmul.mubr.msk.bf16.gmra.mrb[12].mxu0 %vm900_vm4, %v894_v15  ;;  %1939 = vmatmul.mubr.msk.f32.gmra.mrb[10].mxu1 %vm900_vm4, %v1155_v61  ;;  %v1165_v15 = vld [vmem:[%s3015_s3 + $0x78] sm:$0xff] }
 0x14d   : > { %1914 = vmatprep.mubr.msk.bf16.mxu0 %vm900_vm4, %v849_v31  ;;  %1941 = vmatprep.mubr.msk.f32.mxu1 %vm900_vm4, %v1156_v63 }
 0x150   : > { %1942 = vmatmul.mubr.msk.f32.gmra.mrb[12].mxu1 %vm900_vm4, %v1157_v0 }
 0x151   : > { %1944 = vmatprep.mubr.msk.f32.mxu1 %vm900_vm4, %v1158_v2 }
 0x154   : > { %1915 = vmatmul.mubr.msk.bf16.vlgmr.msra.gmra.mrb[4].mxu0 %vm900_vm4, %v850_v36  ;;  %1945 = vmatmul.mubr.msk.f32.gmra.mrb[14].mxu1 %vm900_vm4, %v1159_v4 }
 0x155   : > { %1918 = vmatprep.mubr.msk.bf16.mxu0 %vm900_vm4, %v851_v41  ;;  %1947 = vmatprep.mubr.msk.f32.mxu1 %vm900_vm4, %v1160_v5 }
 0x158   : > { %1948 = vmatmul.mubr.msk.f32.gmra.mrb[16].mxu1 %vm900_vm4, %v1161_v7 }
 0x159   : > { %1950 = vmatprep.mubr.msk.f32.mxu1 %vm900_vm4, %v1162_v9 }
 0x15c   : > { %1919 = vmatmul.mubr.msk.bf16.gmra.mrb[8].mxu0 %vm900_vm4, %v852_v46  ;;  %1951 = vmatmul.mubr.msk.f32.gmra.mrb[18].mxu1 %vm900_vm4, %v1163_v10 }
 0x15d   : > { %1922 = vmatprep.mubr.msk.bf16.mxu0 %vm900_vm4, %v853_v53  ;;  %1953 = vmatprep.mubr.msk.f32.mxu1 %vm900_vm4, %v1164_v12 }
 0x160   : > { %1954 = vmatmul.mubr.msk.f32.gmra.mrb[20].mxu1 %vm900_vm4, %v1165_v15 }
 0x161   : > { %1988 = vmatprep.mubr.msk.f32.mxu1 %vm2290_vm0, %v2288_v14 }
 0x164   : > { %1923 = vmatmul.mubr.msk.bf16.gmra.mrb[12].mxu0 %vm900_vm4, %v854_v62 }
 0x165   : > { %1926 = vmatprep.mubr.msk.bf16.mxu0 %vm900_vm4, %v855_v11 }
 0x16c   : > { %1927 = vmatmul.mubr.msk.bf16.gmra.mrb[16].mxu0 %vm900_vm4, %v856_v18 }
 0x20f   : > { %v2909_v21 = vpop.f32.mrb[4].mxu1 }
 0x210   : > { %v2911_v24 = vpop.f32.mrb[5].mxu1 }
 0x211   : > { %v2913_v14 = vpop.f32.mrb[6].mxu1 }
 0x212   : > { %v2915_v26 = vpop.f32.mrb[7].mxu1 }
 0x217   : > { %v1934_v27 = vpop.f32.mrb[2].mxu1 }
 0x218   : > { %v1281_v29 = vpop.f32.mrb[3].mxu1 }
 0x21b   : > { %v1937_v31 = vpop.f32.mrb[8].mxu1 }
 0x21c   : > { %v1291_v33 = vpop.f32.mrb[9].mxu1 }
 0x21f   : > { %v1940_v34 = vpop.f32.mrb[10].mxu1 }
 0x220   : > { %v1301_v35 = vpop.f32.mrb[11].mxu1 }
 0x223   : > { %v1943_v36 = vpop.f32.mrb[12].mxu1 }
 0x224   : > { %v1311_v37 = vpop.f32.mrb[13].mxu1 }
 0x227   : > { %v1916_v38 = vpop.f32.mrb[4].mxu0  ;;  %v2924_v40 = vpop.f32.mrb[14].mxu1 }
 0x228   : > { %v1362_v41 = vadd.f32 %v1916_v38, %v1291_v33  ;;  %v1087_v42 = vpop.f32.mrb[5].mxu0  ;;  %v1321_v43 = vpop.f32.mrb[15].mxu1 }
 0x229   : > { %v1360_v44 = vadd.f32 %v1281_v29, %v1087_v42  ;;  %v1917_v45 = vpop.f32.mrb[6].mxu0 }
 0x22a   : > { %v1385_v46 = vadd.f32 %v2922_v39, %v1362_v41  ;;  %v1363_v48 = vadd.f32 %v1937_v31, %v1917_v45  ;;  %v1090_v49 = vpop.f32.mrb[7].mxu0 }
 0x22b   : > { %v1383_v50 = vadd.f32 %v2922_v39, %v1360_v44  ;;  %v1361_v51 = vadd.f32 %v1934_v27, %v1090_v49  ;;  %v1949_v53 = vpop.f32.mrb[16].mxu1 }
 0x22c   : > { %v1417_v54 = vmul.f32 0.01, %v1385_v46  ;;  %v1386_v55 = vadd.f32 %v2922_v39, %v1363_v48  ;;  %v1331_v57 = vpop.f32.mrb[17].mxu1  ;;  %vm1401_vm0 = vcmp.gt.f32.partialorder %v1385_v46, 0.0 }
 0x22d   : > { %v1415_v60 = vmul.f32 0.01, %v1383_v50  ;;  %v1384_v62 = vadd.f32 %v2922_v39, %v1361_v51  ;;  %vm1399_vm4 = vcmp.gt.f32.partialorder %v1383_v50, 0.0 }
 0x22e   : > { %vm1402_vm7 = vcmp.gt.f32.partialorder %v1386_v55, 0.0  ;;  %v1418_v1 = vmul.f32 0.01, %v1386_v55  ;;  %v1433_v11 = vsel %vm1401_vm0, %v1385_v46, %v1417_v54 }
 0x22f   : > { %vm1400_vm8 = vcmp.gt.f32.partialorder %v1384_v62, 0.0  ;;  %v1416_v3 = vmul.f32 0.01, %v1384_v62  ;;  %v1920_v6 = vpop.f32.mrb[8].mxu0  ;;  %v2930_v8 = vpop.f32.mrb[18].mxu1  ;;  %v1431_v47 = vsel %vm1399_vm4, %v1383_v50, %v1415_v60 }
 0x230   : > { %v1434_v13 = vsel %vm1402_vm7, %v1386_v55, %v1418_v1  ;;  %v1366_v16 = vadd.f32 %v1920_v6, %v1311_v37  ;;  %v1103_v17 = vpop.f32.mrb[9].mxu0  ;;  %v2932_v18 = vpop.f32.mrb[19].mxu1 }
 0x231   : > { %v1432_v19 = vsel %vm1400_vm8, %v1384_v62, %v1416_v3  ;;  %v1364_v20 = vadd.f32 %v1301_v35, %v1103_v17  ;;  %v1921_v22 = vpop.f32.mrb[10].mxu0  ;;  %v2051_v25 = vpack.c.bf16 %v1434_v13, %v1433_v11 }
 0x232   : > { %v1389_v28 = vadd.f32 %v2922_v39, %v1366_v16  ;;  %v1367_v30 = vadd.f32 %v1943_v36, %v1921_v22  ;;  %v1106_v32 = vpop.f32.mrb[11].mxu0  ;;  %v2048_v52 = vpack.c.bf16 %v1432_v19, %v1431_v47 }
 0x233   : > { %v1387_v56 = vadd.f32 %v2922_v39, %v1364_v20  ;;  %v1365_v58 = vadd.f32 %v1940_v34, %v1106_v32  ;;  %v1955_v59 = vpop.f32.mrb[20].mxu1 }
 0x234   : > { %v1421_v61 = vmul.f32 0.01, %v1389_v28  ;;  %v1390_v63 = vadd.f32 %v2922_v39, %v1367_v30  ;;  %2049 = vmatpush3.bf16.msra.mxu1 %v2048_v52  ;;  %v1351_v0 = vpop.f32.mrb[21].mxu1  ;;  %vm1405_vm9 = vcmp.gt.f32.partialorder %v1389_v28, 0.0 }
 0x235   : > { %v1419_v2 = vmul.f32 0.01, %v1387_v56  ;;  %v1388_v4 = vadd.f32 %v2922_v39, %v1365_v58  ;;  %2050 = vmatprep.subr.bf16.mxu1 %v2289_v23  ;;  %vm1403_vm10 = vcmp.gt.f32.partialorder %v1387_v56, 0.0 }
 0x236   : > { %vm1406_vm11 = vcmp.gt.f32.partialorder %v1390_v63, 0.0  ;;  %v1422_v5 = vmul.f32 0.01, %v1390_v63  ;;  %v1437_v10 = vsel %vm1405_vm9, %v1389_v28, %v1421_v61 }
 0x237   : > { %vm1404_vm12 = vcmp.gt.f32.partialorder %v1388_v4, 0.0  ;;  %v1420_v7 = vmul.f32 0.01, %v1388_v4  ;;  %v1924_v9 = vpop.f32.mrb[12].mxu0  ;;  %v1435_v29 = vsel %vm1403_vm10, %v1387_v56, %v1419_v2 }
 0x238   : > { %v1438_v12 = vsel %vm1406_vm11, %v1390_v63, %v1422_v5  ;;  %v1370_v15 = vadd.f32 %v1924_v9, %v1331_v57  ;;  %v1119_v27 = vpop.f32.mrb[13].mxu0  ;;  %2052 = vmatpush3.bf16.msra.mxu1 %v2051_v25 }
 0x239   : > { %v1436_v31 = vsel %vm1404_vm12, %v1388_v4, %v1420_v7  ;;  %v1368_v33 = vadd.f32 %v1321_v43, %v1119_v27  ;;  %v1925_v34 = vpop.f32.mrb[14].mxu0  ;;  %2053 = vmatprep.subr.bf16.mxu1 %v2289_v23  ;;  %v2057_v35 = vpack.c.bf16 %v1438_v12, %v1437_v10 }
 0x23a   : > { %v1393_v36 = vadd.f32 %v2922_v39, %v1370_v15  ;;  %v1371_v37 = vadd.f32 %v1949_v53, %v1925_v34  ;;  %v1122_v38 = vpop.f32.mrb[15].mxu0  ;;  %v2054_v41 = vpack.c.bf16 %v1436_v31, %v1435_v29 }
 0x23b   : > { %v1391_v42 = vadd.f32 %v2922_v39, %v1368_v33  ;;  %v1369_v44 = vadd.f32 %v2924_v40, %v1122_v38 }
 0x23c   : > { %v1425_v45 = vmul.f32 0.01, %v1393_v36  ;;  %v1394_v46 = vadd.f32 %v2922_v39, %v1371_v37  ;;  %2055 = vmatpush3.bf16.msra.mxu1 %v2054_v41  ;;  %vm1409_vm13 = vcmp.gt.f32.partialorder %v1393_v36, 0.0 }
 0x23d   : > { %v1423_v48 = vmul.f32 0.01, %v1391_v42  ;;  %v1392_v43 = vadd.f32 %v2922_v39, %v1369_v44  ;;  %2056 = vmatprep.subr.bf16.mxu1 %v2289_v23  ;;  %vm1407_vm14 = vcmp.gt.f32.partialorder %v1391_v42, 0.0 }
 0x23e   : > { %vm1410_vm15 = vcmp.gt.f32.partialorder %v1394_v46, 0.0  ;;  %v1426_v49 = vmul.f32 0.01, %v1394_v46  ;;  %v1441_v53 = vsel %vm1409_vm13, %v1393_v36, %v1425_v45 }
 0x23f   : > { %vm1408_vm1 = vcmp.gt.f32.partialorder %v1392_v43, 0.0  ;;  %v1424_v50 = vmul.f32 0.01, %v1392_v43  ;;  %v1928_v51 = vpop.f32.mrb[16].mxu0  ;;  %v1439_v57 = vsel %vm1407_vm14, %v1391_v42, %v1423_v48 }
 0x240   : > { %v1442_v54 = vsel %vm1410_vm15, %v1394_v46, %v1426_v49  ;;  %v1144_v40 = vadd.f32 %v1928_v51, %v2909_v21  ;;  %v1135_v55 = vpop.f32.mrb[17].mxu0  ;;  %2058 = vmatpush3.bf16.msra.mxu1 %v2057_v35 }
 0x241   : > { %v1440_v60 = vsel %vm1408_vm1, %v1392_v43, %v1424_v50  ;;  %v1136_v62 = vadd.f32 %v1135_v55, %v2911_v24  ;;  %v1929_v1 = vpop.f32.mrb[18].mxu0  ;;  %2059 = vmatprep.subr.bf16.mxu1 %v2289_v23  ;;  %v2063_v3 = vpack.c.bf16 %v1442_v54, %v1441_v53 }
 0x242   : > { %v1147_v6 = vadd.f32 %v1929_v1, %v2913_v14  ;;  %v1374_v11 = vadd.f32 %v1351_v0, %v1144_v40  ;;  %v1138_v13 = vpop.f32.mrb[19].mxu0  ;;  %v2060_v16 = vpack.c.bf16 %v1440_v60, %v1439_v57 }
 0x243   : > { %v1372_v17 = vadd.f32 %v2932_v18, %v1136_v62  ;;  %v1139_v47 = vadd.f32 %v1138_v13, %v2915_v26 }
 0x244   : > { %v1375_v21 = vadd.f32 %v1955_v59, %v1147_v6  ;;  %v1397_v19 = vadd.f32 %v2922_v39, %v1374_v11  ;;  %2061 = vmatpush3.bf16.msra.mxu1 %v2060_v16  ;;  %v1716_v59 = vld [vmem:[%s434_s18] ss:$0 sm:$0xff] }
 0x245   : > { %v1395_v20 = vadd.f32 %v2922_v39, %v1372_v17  ;;  %v1373_v24 = vadd.f32 %v2930_v8, %v1139_v47  ;;  %2062 = vmatprep.subr.bf16.mxu1 %v2289_v23 }
 0x246   : > { %v1398_v22 = vadd.f32 %v2922_v39, %v1375_v21  ;;  %v1429_v14 = vmul.f32 0.01, %v1397_v19  ;;  %vm1413_vm2 = vcmp.gt.f32.partialorder %v1397_v19, 0.0 }
 0x247   : > { %v1427_v25 = vmul.f32 0.01, %v1395_v20  ;;  %v1396_v28 = vadd.f32 %v2922_v39, %v1373_v24  ;;  %vm1411_vm3 = vcmp.gt.f32.partialorder %v1395_v20, 0.0  ;;  %v1464_v39 = vpop.trf.xlu0 }
 0x248   : > { %vm1414_vm5 = vcmp.gt.f32.partialorder %v1398_v22, 0.0  ;;  %v1430_v26 = vmul.f32 0.01, %v1398_v22  ;;  %2064 = vmatpush3.bf16.msra.mxu1 %v2063_v3  ;;  %v1445_v30 = vsel %vm1413_vm2, %v1397_v19, %v1429_v14 }
 0x249   : > { %vm1412_vm6 = vcmp.gt.f32.partialorder %v1396_v28, 0.0  ;;  %v1428_v18 = vmul.f32 0.01, %v1396_v28  ;;  %2065 = vmatprep.subr.bf16.mxu1 %v2289_v23  ;;  %v1443_v32 = vsel %vm1411_vm3, %v1395_v20, %v1427_v25 }
 0x24a   : > { %v1446_v8 = vsel %vm1414_vm5, %v1398_v22, %v1430_v26 }
 0x24b   : > { %v1444_v52 = vsel %vm1412_vm6, %v1396_v28, %v1428_v18  ;;  %v2069_v56 = vpack.c.bf16 %v1446_v8, %v1445_v30 }
 0x24c   : > { %v2066_v58 = vpack.c.bf16 %v1444_v52, %v1443_v32 }
 0x24e   : > { %2067 = vmatpush3.bf16.msra.mxu1 %v2066_v58 }
 0x24f   : > { %2068 = vmatprep.subr.bf16.mxu1 %v2289_v23 }
 0x252   : > { %2070 = vmatpush3.bf16.msra.mxu1 %v2069_v56 }
 0x255   : > { %1989 = vmatmul.mubr.f32.vlgmr.msra.gmra.mrb[0].mxu1 %v1464_v39 }
 0x325   : > { %1560 = sbr.rel (%p1783_p9) target bundleno = 831 (0x33f), region = 72 }
 0x328   : > { %v1546_v61 = vpop.f32.mrb[0].mxu1 }
 0x329   : > { %v2075_v63 = vadd.f32 %v1716_v59, %v1546_v61  ;;  %v1990_v0 = vpop.f32.mrb[1].mxu1 }
 0x32b   : > { %1551 = vst [vmem:[#allocation4] sm:$0xff] %v2075_v63  ;;  %1556 = vst [vmem:[#allocation2] sm:$0xff] %v2075_v63 }
 0x332   : > { %v1561_v2 = vld [vmem:[#allocation4] sm:$0xff] }
 0x333   : > { %2170 = vtanh.f32 %v1561_v2 }
 0x33d   : > { %v2171_v4 = vpop.eup %2170 }
 0x33e   : > { %1563 = vst [vmem:[#allocation8] sm:$0xff] %v2171_v4 }
 0x33f PF: > { %s3024_s14 = sadd.s32 4294967295, %s2282_s10   ;;  %s2291_s22 = smov [#allocation8]  }
 0x340   : > { %p2968_p5 = scmp.eq.s32.totalorder %s3024_s14, 2  ;;  %s1571_s18 = sshll.u32 %s2291_s22, 4  ;;  %s1572_s18 = int_to_ptr.vmem [resolvable:$true] %s1571_s18 }
 0x341   : > { %s2202_s20 = scalar_lea.vmem %s1572_s18, 128  ;;  %p2209_p12 = scmp.lt.s32.totalorder %s1572_s18, %s1572_s18 }
 0x342   : > { %p2203_p6 = scmp.ne.s32.totalorder %s1572_s18, %s2202_s20  ;;  %p2210_p0 = scmp.lt.s32.totalorder %s2202_s20, %s2202_s20 }
 0x344   : > { %p2204_p8 = pnand %p2203_p6, %p2968_p5  ;;  %p2211_p1 = por %p2210_p0, %p2209_p12 }
 0x346   : > { %p2205_p10 = pneg %p2204_p8 }
 0x348   : > { %p2212_p2 = pnand %p2211_p1, %p2205_p10 }
 0x34a   : > { %2215 = shalt.err (!%p2212_p2)
}
 0x34b   : > { %s2216_s21 = scalar_lea.hbm %s3020_s8, 128 }
 0x34c   : > { %p2217_p11 = scmp.ne.s32.totalorder %s3020_s8, %s2216_s21  ;;  %p2222_p4 = scmp.lt.u32.totalorder %s2216_s21, %s3020_s8 }
 0x34e   : > { %p2218_p13 = pnand %p2217_p11, %p2968_p5 }
 0x350   : > { %p2219_p3 = pneg %p2218_p13 }
 0x352   : > { %p2224_p7 = pnand %p2222_p4, %p2219_p3 }
 0x354   : > { %2227 = shalt.err (!%p2224_p7)
}
 0x355   : > { %2103 = dma.vmem_to_hbm [thread:$0]  (%p2968_p5), %s1572_s18, 128, %s3020_s8, [#allocation7]  }
 0x356   : > { %2257 = dma.done.wait (%p2968_p5), [#allocation7], 128  }
 0x357   : > { %2259 = vsyncadd (%p2968_p5), [#allocation7], 4294967168 }
 0x358 PF: > { %s22_s10 = sadd.s32 1, %s2282_s10   ;;  %s3026_s27 = smov %s2266_s28 }
 0x359   : > { %p19_p9 = scmp.ge.s32.totalorder %s22_s10, 5   ;;  %s3027_s28 = smov %s2270_s29 }
 0x35a   : > { %s3028_s29 = smov %s2384_s16  ;;  %s3029_s30 = smov %s2278_s9 }
 0x35b   : > { %s3030_s9 = smov %s3032_s12  ;;  %21 = sbr.rel (!%p19_p9) target bundleno = 5 (0x5), region = 123 }
 0x362   :  { %1584 = vsyncpa [#allocation6], 1 }
 0x363   :  { %1586 = vsyncpa [#allocation6 + $0x1], 1 }
 0x364   :  { %1587 = vsyncpa [#allocation7], 1 }
 0x365   :  { %1589 = vsyncpa [#allocation7 + $0x1], 1 }

</bundles_post_ra>
